<compile_context>
chip_gen: v7x
topology: tpu7x:2x2x1
jax: 0.10.0
libtpu: 0.0.40
codegen_flags: <defaults>
</compile_context>

<pallas_src>
import functools

import jax
import jax.numpy as jnp
from jax.experimental import pallas as pl
from jax.experimental.pallas import tpu as pltpu


def _round_up(n, k):
    return (n + k - 1) // k * k


def _round_down_128(n):
    return max(128, (n // 128) * 128)


def _tpu_vmem_capacity_bytes():
    try:
        cap = int(pltpu.get_tpu_info().vmem_capacity_bytes)
        if cap > 0:
            return cap
    except Exception:
        pass
    return 64 << 20  # conservative default (v7x per-TC VMEM)


def _tpu_num_tensorcores():
    try:
        info = pltpu.get_tpu_info()
        for attr in ("num_cores", "num_tensorcores", "tensorcore_count", "cores_per_chip"):
            n = getattr(info, attr, None)
            if n:
                return int(n)
    except Exception:
        pass
    try:
        kind = jax.devices()[0].device_kind.lower()
        if any(tag in kind for tag in ("v7", "7x", "v5p", "v4")):
            return 2
    except Exception:
        pass
    return 1


def _amsm_kernel(inv_x_ref, lab_ref, x_ref, inv_w_ref, w_ref, out_ref, *, sm, has_label):
    # x: (B, F), w: (F, tile_c) in their streamed dtype -> canonical MXU matmul
    # with fp32 accumulation.  Normalization (and s, folded by the wrapper when
    # a label is given) is applied AFTER the matmul via precomputed fp32
    # row/column inverse norms: no XLU reductions or transposes in the hot loop.
    logits = jnp.dot(x_ref[...], w_ref[...], preferred_element_type=jnp.float32)  # (B, tc)
    out = (logits * inv_x_ref[...]) * inv_w_ref[...]                              # (B,1)*(1,tc)

    if has_label:
        j = pl.program_id(0)
        b, tc = out.shape
        class_ids = j * tc + jax.lax.broadcasted_iota(jnp.int32, (b, tc), 1)
        # s*(cos - m*one_hot) == s*cos - (s*m) on the matching class.
        out = jnp.where(class_ids == lab_ref[...], out - sm, out)

    out_ref[...] = out.astype(out_ref.dtype)


def amsm_loss_forward(x, W, label=None, *, s=30.0, m=0.4, tile_c=None, compute_dtype=None):
    """Pallas implementation of AMSMLoss.forward.

    x:     (B, F) float
    W:     (C, F) float (unnormalized parameter, like nn.Parameter)
    label: optional (B,) int class indices
    compute_dtype: optional dtype (e.g. jnp.bfloat16) for the streamed x/W;
                   inverse norms are always computed from the fp32 sources.
    """
    B, F = x.shape
    C, F_w = W.shape
    assert F == F_w, "feature dims of x and W must match"

    n_cores = _tpu_num_tensorcores()
    vmem_cap = _tpu_vmem_capacity_bytes()

    stream_dtype = jnp.dtype(compute_dtype) if compute_dtype is not None else jnp.dtype(x.dtype)
    w_itemsize = stream_dtype.itemsize

    # ---- class-tile selection (VMEM-budget driven, generation aware) -------
    c128 = _round_up(C, 128)
    if tile_c is not None:
        tc = min(_round_up(int(tile_c), 128), c128)
    else:
        # Target multi-MiB W tiles (85%-of-roofline regime) but never more than
        # ~1/16 of VMEM per buffer so double-buffered streaming always fits.
        per_buf_budget = min(4 << 20, vmem_cap // 16)
        tc = _round_down_128(per_buf_budget // max(F * w_itemsize, 1))
        tc = min(tc, c128)
    if n_cores > 1 and c128 > 128:
        # Multi-TC (v7x / megacore): aim for >= 2 grid steps PER TensorCore so
        # each core's W DMA stays pipelined; never shrink below one 128 lane tile.
        tc = min(tc, _round_down_128(c128 // (2 * n_cores)))
    tc = min(max(tc, 128), c128)
    C_pad = _round_up(C, tc)
    grid_c = C_pad // tc

    # ---- wrapper-side norms (fp32 sources, computed exactly once) ----------
    x32 = x.astype(jnp.float32)
    inv_x = jax.lax.rsqrt(jnp.maximum(jnp.sum(x32 * x32, axis=1, keepdims=True), 1e-24))  # (B,1)
    has_label = label is not None
    if has_label:
        inv_x = inv_x * jnp.float32(s)  # fold s into the cheap (B,1) row scale

    W32 = W.astype(jnp.float32)
    inv_w = jax.lax.rsqrt(jnp.maximum(jnp.sum(W32 * W32, axis=1, keepdims=True), 1e-24))  # (C,1)
    inv_w = inv_w.reshape(1, C)
    if C_pad != C:
        inv_w = jnp.pad(inv_w, ((0, 0), (0, C_pad - C)))  # zero scale on padded classes

    # Transposed (F, C_pad) weight stream: canonical MXU orientation, class dim
    # lane-dense and matching the output tile.
    # TODO(synk): for repeated forwards, cache W_t / inv_w (and a bf16 copy)
    # instead of transposing + renormalizing per call.
    W_t = W.T
    if C_pad != C:
        W_t = jnp.pad(W_t, ((0, 0), (0, C_pad - C)))
    x_in = x if x.dtype == stream_dtype else x.astype(stream_dtype)
    W_t = W_t if W_t.dtype == stream_dtype else W_t.astype(stream_dtype)

    if has_label:
        label_arr = jnp.asarray(label).reshape(B, 1).astype(jnp.int32)
    else:
        label_arr = jnp.zeros((B, 1), dtype=jnp.int32)

    kernel = functools.partial(_amsm_kernel, sm=float(s) * float(m), has_label=has_label)

    # Explicit VMEM budget from the actual tile sizes, ~30% headroom vs capacity.
    x_itemsize = jnp.dtype(x_in.dtype).itemsize
    vmem_need = (
        2 * F * tc * w_itemsize      # W tile double buffer
        + 2 * tc * 4                 # inv_w tile double buffer
        + 2 * B * tc * 4             # fp32 output double buffer
        + 2 * B * F * x_itemsize     # grid-invariant x
        + 4 * B * 4                  # inv_x + labels
    )
    vmem_limit = int(max(min(max(2 * vmem_need, 16 << 20), int(0.7 * vmem_cap)), 8 << 20))

    # TODO(synk): for large batches add the batch axis as the INNER grid axis
    # with x blocked (tile_b, F) and the W index_map ignoring it, so W is read
    # from HBM exactly once per forward.
    out = pl.pallas_call(
        kernel,
        out_shape=jax.ShapeDtypeStruct((B, C_pad), jnp.float32),
        grid_spec=pltpu.PrefetchScalarGridSpec(
            num_scalar_prefetch=0,
            grid=(grid_c,),
            in_specs=[
                pl.BlockSpec((B, 1), lambda j: (0, 0)),    # inv_x (grid-invariant)
                pl.BlockSpec((B, 1), lambda j: (0, 0)),    # labels (grid-invariant)
                pl.BlockSpec((B, F), lambda j: (0, 0)),    # x      (grid-invariant)
                pl.BlockSpec((1, tc), lambda j: (0, j)),   # inv_w  (streams with W)
                pl.BlockSpec((F, tc), lambda j: (0, j)),   # W^T class tile (streams)
            ],
            out_specs=pl.BlockSpec((B, tc), lambda j: (0, j)),
        ),
        compiler_params=pltpu.CompilerParams(
            dimension_semantics=("parallel",),
            vmem_limit_bytes=vmem_limit,
        ),
    )(inv_x, label_arr, x_in, inv_w, W_t)

    if C_pad != C:
        out = out[:, :C]
    return out


def _reference(x, W, label=None, s=30.0, m=0.4):
    xn = x / jnp.maximum(jnp.linalg.norm(x, axis=1, keepdims=True), 1e-12)
    wn = W / jnp.maximum(jnp.linalg.norm(W, axis=1, keepdims=True), 1e-12)
    logits = xn @ wn.T
    if label is None:
        return logits
    one_hot = jax.nn.one_hot(label, W.shape[0], dtype=logits.dtype)
    return (logits - m * one_hot) * s


if __name__ == "__main__":
    s_val, m_val = 30.0, 0.4
    key = jax.random.PRNGKey(0)
    k1, k2, k3, k4, k5, k6 = jax.random.split(key, 6)

    # --- Config 1: B=8, F=32, C=256, fp32, budget-derived tile ---------------
    B1, F1, C1 = 8, 32, 256
    x1 = jax.random.normal(k1, (B1, F1), dtype=jnp.float32)
    bound1 = (6.0 / (C1 + F1)) ** 0.5   # deterministic xavier_uniform-style init
    W1 = jax.random.uniform(k2, (C1, F1), dtype=jnp.float32, minval=-bound1, maxval=bound1)
    lab1 = jax.random.randint(k3, (B1,), 0, C1, dtype=jnp.int32)

    logits1 = jax.block_until_ready(amsm_loss_forward(x1, W1, None, s=s_val, m=m_val))
    out1 = jax.block_until_ready(amsm_loss_forward(x1, W1, lab1, s=s_val, m=m_val))
    assert jnp.allclose(logits1, _reference(x1, W1, None, s_val, m_val), atol=1e-5, rtol=1e-5)
    assert jnp.allclose(out1, _reference(x1, W1, lab1, s_val, m_val), atol=1e-4, rtol=1e-5)

    # --- Config 2: ragged C (576), explicit 128-wide tiles (multi-step stream)
    B2, F2, C2 = 8, 64, 576
    x2 = jax.random.normal(k4, (B2, F2), dtype=jnp.float32)
    bound2 = (6.0 / (C2 + F2)) ** 0.5
    W2 = jax.random.uniform(k5, (C2, F2), dtype=jnp.float32, minval=-bound2, maxval=bound2)
    lab2 = jax.random.randint(k6, (B2,), 0, C2, dtype=jnp.int32)

    out2 = jax.block_until_ready(
        amsm_loss_forward(x2, W2, lab2, s=s_val, m=m_val, tile_c=128)
    )
    assert jnp.allclose(out2, _reference(x2, W2, lab2, s_val, m_val), atol=1e-4, rtol=1e-5)

    # --- Config 3: bf16 streaming of x/W (halved HBM bytes), fp32 norms ------
    out3 = jax.block_until_ready(
        amsm_loss_forward(x2, W2, lab2, s=s_val, m=m_val, compute_dtype=jnp.bfloat16)
    )
    assert jnp.max(jnp.abs(out3 - _reference(x2, W2, lab2, s_val, m_val))) < 0.25

    print("KERNEL_OK")
</pallas_src>

<mosaic_0001>
module attributes {stable_mosaic.version = 11 : i64} {
  func.func @_amsm_kernel(%arg0: i32, %arg1: memref<8x1xf32, #tpu.memory_space<vmem>>, %arg2: memref<8x1xi32, #tpu.memory_space<vmem>>, %arg3: memref<8x32xf32, #tpu.memory_space<vmem>>, %arg4: memref<1x256xf32, #tpu.memory_space<vmem>>, %arg5: memref<32x256xf32, #tpu.memory_space<vmem>>, %arg6: memref<8x256xf32, #tpu.memory_space<vmem>>) attributes {dimension_semantics = [#tpu.dimension_semantics<parallel>], iteration_bounds = array<i64: 1>, scalar_prefetch = 0 : i64, scratch_operands = 0 : i64, tpu.core_type = #tpu.core_type<tc>, window_params = [{pipeline_mode = #tpu.pipeline_mode<synchronous>, transform_indices = @transform_0, window_bounds = array<i64: 8, 1>}, {pipeline_mode = #tpu.pipeline_mode<synchronous>, transform_indices = @transform_1, window_bounds = array<i64: 8, 1>}, {pipeline_mode = #tpu.pipeline_mode<synchronous>, transform_indices = @transform_2, window_bounds = array<i64: 8, 32>}, {transform_indices = @transform_3, window_bounds = array<i64: 1, 256>}, {transform_indices = @transform_4, window_bounds = array<i64: 32, 256>}, {transform_indices = @transform_5, window_bounds = array<i64: 8, 256>}]} {
    %c0 = arith.constant 0 : index
    %c0_0 = arith.constant 0 : index
    %0 = vector.load %arg3[%c0, %c0_0] : memref<8x32xf32, #tpu.memory_space<vmem>>, vector<8x32xf32>
    %c0_1 = arith.constant 0 : index
    %c0_2 = arith.constant 0 : index
    %1 = vector.load %arg5[%c0_1, %c0_2] : memref<32x256xf32, #tpu.memory_space<vmem>>, vector<32x256xf32>
    %cst = arith.constant dense<0.000000e+00> : vector<8x256xf32>
    %2 = tpu.matmul %0, %1, %cst {dimension_numbers = #tpu.dot_dimension_numbers<[1], [0], [0], [1], [0, 0, 1, 1], [], []>} : vector<8x32xf32>, vector<32x256xf32>, vector<8x256xf32> -> vector<8x256xf32>
    %c0_3 = arith.constant 0 : index
    %c0_4 = arith.constant 0 : index
    %3 = vector.load %arg1[%c0_3, %c0_4] : memref<8x1xf32, #tpu.memory_space<vmem>>, vector<8x1xf32>
    %4 = vector.broadcast %3 : vector<8x1xf32> to vector<8x256xf32>
    %5 = arith.mulf %2, %4 : vector<8x256xf32>
    %c0_5 = arith.constant 0 : index
    %c0_6 = arith.constant 0 : index
    %6 = vector.load %arg4[%c0_5, %c0_6] : memref<1x256xf32, #tpu.memory_space<vmem>>, vector<1x256xf32>
    %7 = vector.broadcast %6 : vector<1x256xf32> to vector<8x256xf32>
    %8 = arith.mulf %5, %7 : vector<8x256xf32>
    %c0_7 = arith.constant 0 : index
    %c0_8 = arith.constant 0 : index
    %9 = vector.load %arg6[%c0_7, %c0_8] : memref<8x256xf32, #tpu.memory_space<vmem>>, vector<8x256xf32>
    tpu.vector_store %arg6[%c0_7, %c0_8], %8 {strides = array<i32>} : memref<8x256xf32, #tpu.memory_space<vmem>>, vector<8x256xf32>,
    return
  }
  func.func @transform_0(%arg0: i32) -> (i32, i32) {
    %c0_i32 = arith.constant 0 : i32
    %c0_i32_0 = arith.constant 0 : i32
    %c0_i32_1 = arith.constant 0 : i32
    return %c0_i32, %c0_i32_0 : i32, i32
  }
  func.func @transform_1(%arg0: i32) -> (i32, i32) {
    %c0_i32 = arith.constant 0 : i32
    %c0_i32_0 = arith.constant 0 : i32
    %c0_i32_1 = arith.constant 0 : i32
    return %c0_i32, %c0_i32_0 : i32, i32
  }
  func.func @transform_2(%arg0: i32) -> (i32, i32) {
    %c0_i32 = arith.constant 0 : i32
    %c0_i32_0 = arith.constant 0 : i32
    %c0_i32_1 = arith.constant 0 : i32
    return %c0_i32, %c0_i32_0 : i32, i32
  }
  func.func @transform_3(%arg0: i32) -> (i32, i32) {
    %c0_i32 = arith.constant 0 : i32
    %c0_i32_0 = arith.constant 0 : i32
    return %c0_i32, %arg0 : i32, i32
  }
  func.func @transform_4(%arg0: i32) -> (i32, i32) {
    %c0_i32 = arith.constant 0 : i32
    %c0_i32_0 = arith.constant 0 : i32
    return %c0_i32, %arg0 : i32, i32
  }
  func.func @transform_5(%arg0: i32) -> (i32, i32) {
    %c0_i32 = arith.constant 0 : i32
    %c0_i32_0 = arith.constant 0 : i32
    return %c0_i32, %arg0 : i32, i32
  }
}

</mosaic_0001>

<bundles_post_ra>
// kernel: tpu_custom_call.1
= control target key start
LH: loop header
LB: loop body
LE: loop exit
PB: predicated region body
PF: predicated region fallthrough
CT: control target
= control target key end

     0   :  { %10 = vsyncpa [#allocation3], 0  ;;  %s291_s0 = inlined_call_operand.vmem [shape: f32[8,1], index: 0, kind: input, shape index: {}]   ;;  %s292_s1 = inlined_call_operand.vmem [shape: s32[8,1], index: 1, kind: input, shape index: {}]   ;;  %s293_s2 = inlined_call_operand.vmem [shape: f32[8,32], index: 2, kind: input, shape index: {}]   ;;  %s294_s3 = inlined_call_operand.vmem [shape: f32[1,256], index: 3, kind: input, shape index: {}]   ;;  %s295_s4 = inlined_call_operand.hbm [shape: f32[32,256], index: 4, kind: input, shape index: {}]   ;;  %s296_s5 = inlined_call_operand.hbm [shape: f32[8,256], index: 5, kind: output, shape index: {}]  }
   0x1   :  { %11 = vsyncpa [#allocation4], 0  ;;  %s222_s18 = smov [#allocation2]   ;;  %s174_s1 = scalar_lea.hbm %s295_s4, 1024 }
   0x2   :  { %s25_s19 = sshll.u32 %s222_s18, 4  ;;  %p175_p0 = scmp.ne.s32.totalorder %s295_s4, %s174_s1  ;;  %s26_s19 = int_to_ptr.vmem [resolvable:$true] %s25_s19 }
   0x3   :  { %p178_p1 = scmp.lt.u32.totalorder %s174_s1, %s295_s4 }
   0x5   :  { %p180_p2 = pnand %p178_p1, %p175_p0 }
   0x7   :  { %183 = shalt.err (!%p180_p2)
}
   0x8   :  { %s184_s26 = scalar_lea.vmem %s26_s19, 1024  ;;  %p189_p4 = scmp.lt.s32.totalorder %s26_s19, %s26_s19 }
   0x9   :  { %p185_p3 = scmp.ne.s32.totalorder %s26_s19, %s184_s26  ;;  %p190_p5 = scmp.lt.s32.totalorder %s184_s26, %s184_s26 }
   0xb   :  { %p191_p6 = por %p190_p5, %p189_p4 }
   0xd   :  { %p192_p7 = pnand %p191_p6, %p185_p3 }
   0xf   :  { %195 = shalt.err (!%p192_p7)
}
  0x10   :  { %s223_s27 = smov 256   ;;  %s224_s28 = smov 16  }
  0x11   :  { %31 = dma.hbm_to_vmem [thread:$0]  %s295_s4, 1024, %s26_s19, [#allocation3], %s223_s27, %s223_s27, %s224_s28  }
  0x12   :  { %218 = dma.done.wait [#allocation3], 1024  }
  0x13   :  { %219 = vsyncadd [#allocation3], 4294966272  ;;  %v225_v0 = vmov 0.0   ;;  %v226_v1 = vmov 0   ;;  %v37_v2 = vld [vmem:[#allocation2 + $0x8] sm:$0xff]  ;;  %v39_v3 = vld [vmem:[#allocation2 + $0x18] sm:$0xff]  ;;  %v129_v16 = vlaneseq }
  0x14   :  { %112 = vmatprep.mubr.f32.mxu0 %v225_v0  ;;  %173 = vset.pattern.permute.xlu0 %v226_v1  ;;  %v36_v4 = vld [vmem:[#allocation2] sm:$0xff]  ;;  %v159_v5 = vpack.c.bf16 %v39_v3, %v37_v2  ;;  %v38_v6 = vld [vmem:[#allocation2 + $0x10] sm:$0xff]  ;;  %v41_v7 = vld [vmem:[#allocation2 + $0x28] sm:$0xff]  ;;  %vm44_vm0 = vcmask 261120  }
  0x15   :  { %v43_v8 = vld [vmem:[#allocation2 + $0x38] sm:$0xff]  ;;  %v161_v9 = vpack.c.bf16 %v38_v6, %v36_v4  ;;  %v40_v11 = vld [vmem:[#allocation2 + $0x20] sm:$0xff]  ;;  %v42_v12 = vld [vmem:[#allocation2 + $0x30] sm:$0xff]  ;;  %v130_v17 = vshrl.u32 %v129_v16, 7 }
  0x16   :  { %v163_v10 = vpack.c.bf16 %v43_v8, %v41_v7  ;;  %160 = vmatprep.subr.bf16.mxu0 %v159_v5  ;;  %v119_v13 = vld [vmem:[%s291_s0] sm:$0xff]  ;;  %v165_v14 = vpack.c.bf16 %v42_v12, %v40_v11  ;;  %s227_s0 = smov [#allocation5]  }
  0x17   :  { %162 = vmatpush1.bf16.msra.mxu0 %v161_v9  ;;  %122 = vperm.xlu0 %173, %v119_v13   ;;  %v35_v15 = vld [vmem:[%s293_s2] sm:$0xff]  ;;  %v131_v18 = vsub.s32 0, %v130_v17  ;;  %v135_v20 = vsub.s32 1, %v130_v17  ;;  %s149_s11 = sshll.u32 %s227_s0, 4  ;;  %s150_s11 = int_to_ptr.vmem [resolvable:$true] %s149_s11 }
  0x18   :  { %164 = vmatprep.subr.bf16.mxu0 %v163_v10  ;;  %v127_v19 = vld [vmem:[%s294_s3] sm:$0x3]  ;;  %s196_s2 = scalar_lea.vmem %s150_s11, 256  ;;  %p201_p9 = scmp.lt.s32.totalorder %s150_s11, %s150_s11 }
  0x19   :  { %v132_v22 = vrot.slane %v127_v19, %v131_v18  ;;  %v136_v24 = vrot.slane %v127_v19, %v135_v20  ;;  %p197_p8 = scmp.ne.s32.totalorder %s150_s11, %s196_s2  ;;  %p202_p10 = scmp.lt.s32.totalorder %s196_s2, %s196_s2 }
  0x1b   :  { %166 = vmatpush1.bf16.msra.mxu0 %v165_v14  ;;  %p203_p11 = por %p202_p10, %p201_p9 }
  0x1d   :  { %p204_p12 = pnand %p203_p11, %p197_p8 }
  0x1e   :  { %158 = vmatmul.mubr.msk.f32.vlgmr.msra.gmra.mrb[0].mxu0 %vm44_vm0, %v35_v15 }
  0x96   :  { %v123_v21 = vpop.permute.xlu0 %122 }
  0xf1   :  { %v114_v23 = vpop.f32.mrb[0].mxu0 }
  0xf2   :  { %v125_v25 = vmul.f32 %v123_v21, %v114_v23  ;;  %v116_v26 = vpop.f32.mrb[1].mxu0 }
  0xf3   :  { %v126_v27 = vmul.f32 %v123_v21, %v116_v26 }
  0xf4   :  { %v139_v28 = vmul.f32 %v132_v22, %v125_v25 }
  0xf5   :  { %v140_v29 = vmul.f32 %v136_v24, %v126_v27 }
  0xf6   :  { %141 = vst [vmem:[#allocation5] sm:$0xff] %v139_v28 }
  0xf7   :  { %142 = vst [vmem:[#allocation5 + $0x8] sm:$0xff] %v140_v29 }
  0xf8   :  { %207 = shalt.err (!%p204_p12)
}
  0xf9   :  { %s208_s13 = scalar_lea.hbm %s296_s5, 256 }
  0xfa   :  { %p209_p13 = scmp.ne.s32.totalorder %s296_s5, %s208_s13  ;;  %p212_p0 = scmp.lt.u32.totalorder %s208_s13, %s296_s5 }
  0xfc   :  { %p214_p1 = pnand %p212_p0, %p209_p13 }
  0xfe   :  { %217 = shalt.err (!%p214_p1)
}
  0xff   :  { %152 = dma.vmem_to_hbm [thread:$0]  %s150_s11, 256, %s296_s5, [#allocation4]  }
 0x100   :  { %220 = dma.done.wait [#allocation4], 256  }
 0x101   :  { %221 = vsyncadd [#allocation4], 4294967040 }
 0x102   :  { %156 = vsyncpa [#allocation3], 1 }
 0x103   :  { %157 = vsyncpa [#allocation4], 1 }

</bundles_post_ra>
